<compile_context>
chip_gen: v7x
topology: tpu7x:2x2x1
jax: 0.10.0
libtpu: 0.0.40
codegen_flags: <defaults>
</compile_context>

<pallas_src>
import functools

import jax
import jax.numpy as jnp
from jax.experimental import pallas as pl
from jax.experimental.pallas import tpu as pltpu


def _round_up(n, m):
    return ((n + m - 1) // m) * m


def _vmem_capacity_bytes():
    """Physical per-core VMEM; conservative (v7x-sized) fallback if the query fails."""
    cap = 64 * 1024 * 1024
    try:
        v = int(getattr(pltpu.get_tpu_info(), "vmem_capacity_bytes", 0))
        if v > 0:
            cap = v
    except Exception:
        pass
    return cap


def _ffn_kernel(x_ref, w1_ref, b1_ref, w2_ref, b2_ref, o_ref, *scratch,
                tnf, slice_slabs, acc_in_out, cdt):
    j = pl.program_id(1)
    acc_ref = o_ref if acc_in_out else scratch[0]

    @pl.when(j == 0)
    def _init():
        # Fold the second bias into the accumulator init (saves an epilogue add).
        acc_ref[...] = jnp.broadcast_to(
            b2_ref[...].astype(acc_ref.dtype), acc_ref.shape)

    if slice_slabs:
        # Weights are fully VMEM-resident; slice the current d_ff slab in-kernel.
        off = pl.multiple_of(j * tnf, 128)      # tnf is a multiple of 128
        w1s = w1_ref[:, pl.ds(off, tnf)]        # (d_model_p, tnf)
        b1s = b1_ref[:, pl.ds(off, tnf)]        # (1, tnf)
        w2s = w2_ref[pl.ds(off, tnf), :]        # (tnf, d_model_p)
    else:
        w1s = w1_ref[...]
        b1s = b1_ref[...]
        w2s = w2_ref[...]

    x = x_ref[...]
    if x.dtype != cdt:
        x = x.astype(cdt)                       # cast on the VPU, not via an HBM pass

    # First linear + ReLU, f32 accumulation on the MXU.
    h = jnp.dot(x, w1s, preferred_element_type=jnp.float32)
    h = jnp.maximum(h + b1s.astype(jnp.float32), 0.0)
    # Dropout: identity (inference / p=0).  # TODO(synk): training dropout omitted.

    # Second linear, accumulated in f32 (directly into o_ref when the output is f32).
    acc_ref[...] += jnp.dot(h.astype(w2s.dtype), w2s,
                            preferred_element_type=jnp.float32).astype(acc_ref.dtype)

    if not acc_in_out:
        @pl.when(j == pl.num_programs(1) - 1)
        def _finalize():
            o_ref[...] = acc_ref[...].astype(o_ref.dtype)


@functools.partial(jax.jit, static_argnames=("tm", "tn_ff", "compute_dtype"))
def position_wise_ffn(x, w1, b1, w2, b2, *, tm=512, tn_ff=512,
                      compute_dtype=jnp.bfloat16):
    """x: (B, S, d_model); w1: (d_model, d_ff); w2: (d_ff, d_model) -> (B, S, d_model)."""
    orig_dtype = x.dtype
    B, S, d_model = x.shape
    d_ff = w1.shape[1]
    M = B * S

    cdt = jnp.dtype(compute_dtype)
    bpe_c = cdt.itemsize
    bpe_x = jnp.dtype(orig_dtype).itemsize      # x stays in its original dtype in HBM
    bpe_o = bpe_x

    # ---- lane/sublane-aligned sizes (static Python ints) ----
    dmp = _round_up(d_model, 128)                             # model dim, lane-dense
    tnf = min(_round_up(tn_ff, 128), _round_up(d_ff, 128))    # d_ff slab, lane-dense
    sub = max(8, 32 // bpe_x)                                 # sublane multiple (8 f32 / 16 bf16)

    phys = _vmem_capacity_bytes()
    cap = max(32 * 1024 * 1024, phys - 16 * 1024 * 1024)      # leave compiler headroom

    acc_in_out = jnp.dtype(orig_dtype) == jnp.dtype(jnp.float32)
    nbuf_w = 1 if hasattr(pl, "Buffered") else 2              # resident-weight buffering

    # ---- weight residency decision ----
    def _w_resident_bytes(dfp_):
        return nbuf_w * (2 * dmp * dfp_ * bpe_c + 8 * (dfp_ + dmp) * 4)

    resident = _w_resident_bytes(_round_up(d_ff, tnf)) <= cap // 2

    # ---- row tile: bigger when streaming weights (arithmetic intensity), split
    #      >= 2 ways when possible so both v7x TensorCores get work ----
    tm_base = tm if resident else max(tm, 1024)
    tm_eff = _round_up(min(tm_base, _round_up(M, sub)), sub)
    if _round_up(M, tm_eff) // tm_eff < 2 and M > sub:
        tm_eff = _round_up(-(-M // 2), sub)

    # ---- shrink tiles until the (correctly counted) VMEM request fits ----
    def _request_bytes(tm_e, tnf_e):
        dfp_ = _round_up(d_ff, tnf_e)
        act = 2 * tm_e * dmp * (bpe_x + bpe_o)                # x + out tiles (2 buffers each)
        acc = 0 if acc_in_out else tm_e * dmp * 4             # f32 accumulator scratch
        inter = tm_e * tnf_e * (4 + bpe_c) + tm_e * dmp * 4   # h (+cast) + 2nd-dot result
        if resident:
            w = _w_resident_bytes(dfp_)
        else:
            w = 2 * (2 * dmp * tnf_e * bpe_c + 8 * (tnf_e + dmp) * 4)
        return act + acc + inter + w

    while _request_bytes(tm_eff, tnf) > cap:
        if tm_eff > 2 * sub:
            tm_eff = max(sub, _round_up(tm_eff // 2, sub))
        elif tnf > 128:
            tnf = max(128, (tnf // 2) // 128 * 128)
        else:
            break

    Mp = _round_up(M, tm_eff)
    dfp = _round_up(d_ff, tnf)
    nj = dfp // tnf
    n_row = Mp // tm_eff
    grid = (n_row, nj)

    # ---- pad / cast operands only when actually needed (zero padding is exact) ----
    x2d = x.reshape(M, d_model)
    if Mp != M or dmp != d_model:
        x2d = jnp.pad(x2d, ((0, Mp - M), (0, dmp - d_model)))

    w1p = w1 if (dmp == d_model and dfp == d_ff) else jnp.pad(
        w1, ((0, dmp - d_model), (0, dfp - d_ff)))
    w2p = w2 if (dfp == d_ff and dmp == d_model) else jnp.pad(
        w2, ((0, dfp - d_ff), (0, dmp - d_model)))
    if w1p.dtype != cdt:
        w1p = w1p.astype(cdt)
    if w2p.dtype != cdt:
        w2p = w2p.astype(cdt)

    b1p = (b1 if dfp == d_ff else jnp.pad(b1, (0, dfp - d_ff))).reshape(1, dfp)
    b2p = (b2 if dmp == d_model else jnp.pad(b2, (0, dmp - d_model))).reshape(1, dmp)
    if b1p.dtype != jnp.float32:
        b1p = b1p.astype(jnp.float32)
    if b2p.dtype != jnp.float32:
        b2p = b2p.astype(jnp.float32)

    # ---- BlockSpecs ----
    def _const_spec(shape):
        imap = lambda i, j: (0,) * len(shape)
        if hasattr(pl, "Buffered"):
            try:   # block never changes -> single buffer (halves resident VMEM)
                return pl.BlockSpec(shape, imap, pipeline_mode=pl.Buffered(1))
            except (TypeError, ValueError):
                pass
        return pl.BlockSpec(shape, imap)

    if resident:
        w1_spec = _const_spec((dmp, dfp))
        b1_spec = _const_spec((1, dfp))
        w2_spec = _const_spec((dfp, dmp))
    else:
        def _jmap(i, j):                 # serpentine: reuse last slab across row tiles
            return j + (i % 2) * (nj - 1 - 2 * j)
        w1_spec = pl.BlockSpec((dmp, tnf), lambda i, j: (0, _jmap(i, j)))
        b1_spec = pl.BlockSpec((1, tnf),   lambda i, j: (0, _jmap(i, j)))
        w2_spec = pl.BlockSpec((tnf, dmp), lambda i, j: (_jmap(i, j), 0))
    b2_spec = _const_spec((1, dmp))

    kernel = functools.partial(
        _ffn_kernel, tnf=tnf, slice_slabs=(resident and nj > 1),
        acc_in_out=acc_in_out, cdt=cdt)

    scratch_shapes = [] if acc_in_out else [pltpu.VMEM((tm_eff, dmp), jnp.float32)]

    req = _request_bytes(tm_eff, tnf)
    vmem_limit = int(min(phys - 8 * 1024 * 1024,
                         max(32 * 1024 * 1024, req + 8 * 1024 * 1024)))

    w_passes = 1 if resident else n_row
    cost = pl.CostEstimate(
        flops=4 * Mp * dmp * dfp,                   # two matmuls, 2 flops / MAC
        transcendentals=0,
        bytes_accessed=(Mp * dmp * (bpe_x + bpe_o)              # x read + out write
                        + w_passes * 2 * dmp * dfp * bpe_c      # weights
                        + w_passes * (dfp + dmp) * 4))          # biases

    out2d = pl.pallas_call(
        kernel,
        out_shape=jax.ShapeDtypeStruct((Mp, dmp), orig_dtype),
        grid_spec=pltpu.PrefetchScalarGridSpec(
            num_scalar_prefetch=0,
            grid=grid,
            in_specs=[
                pl.BlockSpec((tm_eff, dmp), lambda i, j: (i, 0)),   # x rows
                w1_spec, b1_spec, w2_spec, b2_spec,
            ],
            out_specs=pl.BlockSpec((tm_eff, dmp), lambda i, j: (i, 0)),
            scratch_shapes=scratch_shapes,
        ),
        compiler_params=pltpu.CompilerParams(
            dimension_semantics=("parallel", "arbitrary"),
            vmem_limit_bytes=vmem_limit),
        cost_estimate=cost,
    )(x2d, w1p, b1p, w2p, b2p)

    if Mp != M or dmp != d_model:
        out2d = out2d[:M, :d_model]
    return out2d.reshape(B, S, d_model)


if __name__ == "__main__":
    # Small, deterministic shapes consistent with a Transformer FFN block.
    B, S, d_model, d_ff = 2, 8, 128, 256

    key = jax.random.PRNGKey(0)
    kx, k1, kb1, k2, kb2 = jax.random.split(key, 5)

    x = jax.random.normal(kx, (B, S, d_model), dtype=jnp.float32)

    # Deterministic "PyTorch-like" Linear init: U(-1/sqrt(fan_in), 1/sqrt(fan_in)).
    bound1 = 1.0 / (d_model ** 0.5)
    bound2 = 1.0 / (d_ff ** 0.5)
    w1 = jax.random.uniform(k1, (d_model, d_ff), jnp.float32, -bound1, bound1)
    b1 = jax.random.uniform(kb1, (d_ff,), jnp.float32, -bound1, bound1)
    w2 = jax.random.uniform(k2, (d_ff, d_model), jnp.float32, -bound2, bound2)
    b2 = jax.random.uniform(kb2, (d_model,), jnp.float32, -bound2, bound2)

    # Pure-JAX reference.
    ref = jnp.maximum(x @ w1 + b1, 0.0) @ w2 + b2

    # f32 compute path (tight tolerance); output accumulates directly into o_ref.
    out_f32 = position_wise_ffn(x, w1, b1, w2, b2, compute_dtype=jnp.float32)
    jax.block_until_ready(out_f32)
    assert out_f32.shape == (B, S, d_model)
    assert jnp.allclose(out_f32, ref, atol=1e-4, rtol=1e-4), "f32 mismatch vs reference"

    # Default (bf16 MXU compute, f32 accumulation) — looser tolerance.
    out_bf16 = position_wise_ffn(x, w1, b1, w2, b2)
    jax.block_until_ready(out_bf16)
    assert jnp.allclose(out_bf16, ref, atol=5e-2, rtol=5e-2), "bf16-compute mismatch"

    # bf16 activations in/out (exercises the f32 scratch-accumulator path).
    x_bf16 = x.astype(jnp.bfloat16)
    ref_bf16_in = jnp.maximum(x_bf16.astype(jnp.float32) @ w1 + b1, 0.0) @ w2 + b2
    out_bf16_io = position_wise_ffn(x_bf16, w1, b1, w2, b2)
    jax.block_until_ready(out_bf16_io)
    assert out_bf16_io.dtype == jnp.bfloat16
    assert jnp.allclose(out_bf16_io.astype(jnp.float32), ref_bf16_in,
                        atol=1e-1, rtol=1e-1), "bf16-io mismatch"

    print("KERNEL_OK")
</pallas_src>

<mosaic_0001>
module attributes {stable_mosaic.version = 11 : i64} {
  func.func @_ffn_kernel(%arg0: i32, %arg1: i32, %arg2: memref<8x128xf32, #tpu.memory_space<vmem>>, %arg3: memref<128x256xf32, #tpu.memory_space<vmem>>, %arg4: memref<1x256xf32, #tpu.memory_space<vmem>>, %arg5: memref<256x128xf32, #tpu.memory_space<vmem>>, %arg6: memref<1x128xf32, #tpu.memory_space<vmem>>, %arg7: memref<8x128xf32, #tpu.memory_space<vmem>>) attributes {dimension_semantics = [#tpu.dimension_semantics<parallel>, #tpu.dimension_semantics<arbitrary>], iteration_bounds = array<i64: 2, 1>, scalar_prefetch = 0 : i64, scratch_operands = 0 : i64, tpu.core_type = #tpu.core_type<tc>, window_params = [{transform_indices = @transform_0, window_bounds = array<i64: 8, 128>}, {pipeline_mode = #tpu.pipeline_mode<synchronous>, transform_indices = @transform_1, window_bounds = array<i64: 128, 256>}, {pipeline_mode = #tpu.pipeline_mode<synchronous>, transform_indices = @transform_2, window_bounds = array<i64: 1, 256>}, {pipeline_mode = #tpu.pipeline_mode<synchronous>, transform_indices = @transform_3, window_bounds = array<i64: 256, 128>}, {pipeline_mode = #tpu.pipeline_mode<synchronous>, transform_indices = @transform_4, window_bounds = array<i64: 1, 128>}, {transform_indices = @transform_5, window_bounds = array<i64: 8, 128>}]} {
    %c0_i32 = arith.constant 0 : i32
    %0 = arith.cmpi eq, %arg1, %c0_i32 : i32
    %1 = arith.extui %0 : i1 to i32
    %c0_i32_0 = arith.constant 0 : i32
    %2 = arith.cmpi ne, %1, %c0_i32_0 : i32
    scf.if %2 {
      %c0_14 = arith.constant 0 : index
      %c0_15 = arith.constant 0 : index
      %16 = vector.load %arg6[%c0_14, %c0_15] : memref<1x128xf32, #tpu.memory_space<vmem>>, vector<1x128xf32>
      %17 = vector.shape_cast %16 : vector<1x128xf32> to vector<1x128xf32>
      %18 = vector.broadcast %17 : vector<1x128xf32> to vector<8x128xf32>
      %c0_16 = arith.constant 0 : index
      %c0_17 = arith.constant 0 : index
      %19 = vector.load %arg7[%c0_16, %c0_17] : memref<8x128xf32, #tpu.memory_space<vmem>>, vector<8x128xf32>
      tpu.vector_store %arg7[%c0_16, %c0_17], %18 {strides = array<i32>} : memref<8x128xf32, #tpu.memory_space<vmem>>, vector<8x128xf32>,
    } else {
    }
    %c0 = arith.constant 0 : index
    %c0_1 = arith.constant 0 : index
    %3 = vector.load %arg3[%c0, %c0_1] : memref<128x256xf32, #tpu.memory_space<vmem>>, vector<128x256xf32>
    %c0_2 = arith.constant 0 : index
    %c0_3 = arith.constant 0 : index
    %4 = vector.load %arg4[%c0_2, %c0_3] : memref<1x256xf32, #tpu.memory_space<vmem>>, vector<1x256xf32>
    %c0_4 = arith.constant 0 : index
    %c0_5 = arith.constant 0 : index
    %5 = vector.load %arg5[%c0_4, %c0_5] : memref<256x128xf32, #tpu.memory_space<vmem>>, vector<256x128xf32>
    %c0_6 = arith.constant 0 : index
    %c0_7 = arith.constant 0 : index
    %6 = vector.load %arg2[%c0_6, %c0_7] : memref<8x128xf32, #tpu.memory_space<vmem>>, vector<8x128xf32>
    %cst = arith.constant dense<0.000000e+00> : vector<8x256xf32>
    %7 = tpu.matmul %6, %3, %cst {dimension_numbers = #tpu.dot_dimension_numbers<[1], [0], [0], [1], [0, 0, 1, 1], [], []>} : vector<8x128xf32>, vector<128x256xf32>, vector<8x256xf32> -> vector<8x256xf32>
    %8 = vector.broadcast %4 : vector<1x256xf32> to vector<8x256xf32>
    %9 = arith.addf %7, %8 : vector<8x256xf32>
    %cst_8 = arith.constant 0.000000e+00 : f32
    %10 = vector.broadcast %cst_8 : f32 to vector<8x256xf32>
    %11 = arith.maximumf %9, %10 : vector<8x256xf32>
    %c0_9 = arith.constant 0 : index
    %c0_10 = arith.constant 0 : index
    %12 = vector.load %arg7[%c0_9, %c0_10] : memref<8x128xf32, #tpu.memory_space<vmem>>, vector<8x128xf32>
    %cst_11 = arith.constant dense<0.000000e+00> : vector<8x128xf32>
    %13 = tpu.matmul %11, %5, %cst_11 {dimension_numbers = #tpu.dot_dimension_numbers<[1], [0], [0], [1], [0, 0, 1, 1], [], []>} : vector<8x256xf32>, vector<256x128xf32>, vector<8x128xf32> -> vector<8x128xf32>
    %14 = arith.addf %12, %13 : vector<8x128xf32>
    %c0_12 = arith.constant 0 : index
    %c0_13 = arith.constant 0 : index
    %15 = vector.load %arg7[%c0_12, %c0_13] : memref<8x128xf32, #tpu.memory_space<vmem>>, vector<8x128xf32>
    tpu.vector_store %arg7[%c0_12, %c0_13], %14 {strides = array<i32>} : memref<8x128xf32, #tpu.memory_space<vmem>>, vector<8x128xf32>,
    return
  }
  func.func @transform_0(%arg0: i32, %arg1: i32) -> (i32, i32) {
    %c0_i32 = arith.constant 0 : i32
    %c0_i32_0 = arith.constant 0 : i32
    return %arg0, %c0_i32 : i32, i32
  }
  func.func @transform_1(%arg0: i32, %arg1: i32) -> (i32, i32) {
    %c0_i32 = arith.constant 0 : i32
    %c0_i32_0 = arith.constant 0 : i32
    %c0_i32_1 = arith.constant 0 : i32
    return %c0_i32, %c0_i32_0 : i32, i32
  }
  func.func @transform_2(%arg0: i32, %arg1: i32) -> (i32, i32) {
    %c0_i32 = arith.constant 0 : i32
    %c0_i32_0 = arith.constant 0 : i32
    %c0_i32_1 = arith.constant 0 : i32
    return %c0_i32, %c0_i32_0 : i32, i32
  }
  func.func @transform_3(%arg0: i32, %arg1: i32) -> (i32, i32) {
    %c0_i32 = arith.constant 0 : i32
    %c0_i32_0 = arith.constant 0 : i32
    %c0_i32_1 = arith.constant 0 : i32
    return %c0_i32, %c0_i32_0 : i32, i32
  }
  func.func @transform_4(%arg0: i32, %arg1: i32) -> (i32, i32) {
    %c0_i32 = arith.constant 0 : i32
    %c0_i32_0 = arith.constant 0 : i32
    %c0_i32_1 = arith.constant 0 : i32
    return %c0_i32, %c0_i32_0 : i32, i32
  }
  func.func @transform_5(%arg0: i32, %arg1: i32) -> (i32, i32) {
    %c0_i32 = arith.constant 0 : i32
    %c0_i32_0 = arith.constant 0 : i32
    return %arg0, %c0_i32 : i32, i32
  }
}

</mosaic_0001>

<bundles_post_ra>
// kernel: position_wise_ffn.1
= control target key start
LH: loop header
LB: loop body
LE: loop exit
PB: predicated region body
PF: predicated region fallthrough
CT: control target
= control target key end

     0   :  { %10 = vsyncpa [#allocation3], 0  ;;  %s1308_s0 = inlined_call_operand.hbm [shape: f32[16,128], index: 0, kind: input, shape index: {}]   ;;  %s1309_s1 = inlined_call_operand.hbm [shape: f32[128,256], index: 1, kind: input, shape index: {}]   ;;  %s1310_s2 = inlined_call_operand.vmem [shape: f32[1,256], index: 2, kind: input, shape index: {}]   ;;  %s1311_s3 = inlined_call_operand.hbm [shape: f32[256,128], index: 3, kind: input, shape index: {}]   ;;  %s1312_s4 = inlined_call_operand.vmem [shape: f32[1,128], index: 4, kind: input, shape index: {}]   ;;  %s1313_s5 = inlined_call_operand.hbm [shape: f32[16,128], index: 5, kind: output, shape index: {}]  }
   0x1   :  { %12 = vsyncpa [#allocation3 + $0x1], 0 }
   0x2   :  { %13 = vsyncpa [#allocation6], 0 }
   0x3   :  { %14 = vsyncpa [#allocation4], 0 }
   0x4   :  { %16 = vsyncpa [#allocation4 + $0x1], 0  ;;  %s1045_s18 = smov 0   ;;  %s1047_s19 = smov 0  }
   0x5   :  { %s1049_s20 = smov 0   ;;  %s1051_s21 = smov 0  }
   0x6   :  { %s1053_s22 = smov 0   ;;  %s1055_s23 = smov 0  }
   0x7 LB: > { %s627_s24 = sadd.s32 4294967295, %s1004_s23   ;;  %s628_s25 = sadd.s32 4294967294, %s1004_s23   ;;  %s1004_s23 = sphi %s1055_s23, %s22_s23   ;;  %s1000_s22 = sphi %s1053_s22, %s1335_s22   ;;  %s996_s21 = sphi %s1051_s21, %s1334_s21   ;;  %s992_s20 = sphi %s1049_s20, %s1333_s20   ;;  %s988_s19 = sphi %s1047_s19, %s1332_s19   ;;  %s984_s18 = sphi %s1045_s18, %s1331_s18  }
   0x8   : > { %p54_p0 = scmp.ne.s32.totalorder %s988_s19, %s984_s18  ;;  %p1079_p1 = scmp.eq.s32.totalorder %s627_s24, 0 }
   0x9   : > { %p1083_p2 = scmp.eq.s32.totalorder %s627_s24, 1  ;;  %p168_p3 = scmp.eq.s32.totalorder %s628_s25, 1 }
   0xa   : > { %s1318_s26 = scalar_select %p1079_p1, 1, 0 }
   0xb   : > { %p1089_p4 = por %p1079_p1, %p54_p0  ;;  %p629_p5 = scmp.ge.s32.totalorder %s1004_s23, 1 }
   0xc   : > { %p1094_p6 = por %p168_p3, %p54_p0  ;;  %p175_p7 = scmp.lt.s32.totalorder %s1004_s23, 3 }
   0xd   : > { %s1320_s28 = scalar_select %p1089_p4, 1, 0 }
   0xe   : > { %s1321_s29 = scalar_select %p1094_p6, 1, 0 }
   0xf   : > { %p1099_p8 = pnand %p629_p5, %p175_p7  ;;  %s1006_s6 = smov [#allocation5]  }
  0x10   : > { %s187_s7 = sshll.u32 %s1006_s6, 4  ;;  %s1007_s9 = smov [#allocation7]   ;;  %s1103_s7 = int_to_ptr.vmem [resolvable:$true] %s187_s7 }
  0x11   : > { %p756_p9 = pneg %p1099_p8  ;;  %s203_s10 = sshll.u32 %s1007_s9, 4  ;;  %s1114_s10 = int_to_ptr.vmem [resolvable:$true] %s203_s10 }
  0x12   : > { %s832_s13 = scalar_lea.hbm %s1309_s1, 4096 }
  0x13   : > { %p1110_p11 = pnand %p756_p9, %p1079_p1  ;;  %p833_p12 = scmp.ne.s32.totalorder %s1309_s1, %s832_s13 }
  0x14   : > { %p839_p5 = scmp.lt.u32.totalorder %s832_s13, %s1309_s1 }
  0x15   : > { %p834_p13 = pneg %p1110_p11 }
  0x17   : > { %p835_p0 = pnand %p834_p13, %p833_p12 }
  0x19   : > { %p836_p3 = pneg %p835_p0 }
  0x1b   : > { %p841_p7 = pnand %p839_p5, %p836_p3 }
  0x1d   : > { %844 = shalt.err (!%p841_p7)
}
  0x1e   : > { %s845_s24 = scalar_lea.vmem %s1103_s7, 4096  ;;  %p853_p1 = scmp.lt.s32.totalorder %s1103_s7, %s1103_s7 }
  0x1f   : > { %p846_p9 = scmp.ne.s32.totalorder %s1103_s7, %s845_s24  ;;  %p854_p12 = scmp.lt.s32.totalorder %s845_s24, %s845_s24 }
  0x21   : > { %p848_p10 = pnand %p846_p9, %p834_p13  ;;  %p855_p0 = por %p854_p12, %p853_p1 }
  0x23   : > { %p849_p6 = pneg %p848_p10 }
  0x25   : > { %p856_p4 = pnand %p855_p0, %p849_p6 }
  0x27   : > { %859 = shalt.err (!%p856_p4)
}
  0x28   : > { %s1008_s25 = smov 256   ;;  %s1009_s6 = smov 16  }
  0x29   : > { %759 = dma.hbm_to_vmem [thread:$0]  (!%p1110_p11), %s1309_s1, 4096, %s1103_s7, [#allocation6], %s1008_s25, %s1008_s25, %s1009_s6  }
  0x2a   : > { %s860_s14 = scalar_lea.hbm %s1311_s3, 4096 }
  0x2b   : > { %p861_p1 = scmp.ne.s32.totalorder %s1311_s3, %s860_s14  ;;  %p867_p10 = scmp.lt.u32.totalorder %s860_s14, %s1311_s3 }
  0x2d   : > { %p863_p4 = pnand %p861_p1, %p834_p13 }
  0x2f   : > { %p864_p6 = pneg %p863_p4 }
  0x31   : > { %p869_p3 = pnand %p867_p10, %p864_p6 }
  0x33   : > { %872 = shalt.err (!%p869_p3)
}
  0x34   : > { %s873_s7 = scalar_lea.vmem %s1114_s10, 4096  ;;  %p881_p12 = scmp.lt.s32.totalorder %s1114_s10, %s1114_s10 }
  0x35   : > { %p874_p5 = scmp.ne.s32.totalorder %s1114_s10, %s873_s7  ;;  %p882_p0 = scmp.lt.s32.totalorder %s873_s7, %s873_s7 }
  0x37   : > { %p876_p7 = pnand %p874_p5, %p834_p13  ;;  %p883_p1 = por %p882_p0, %p881_p12 }
  0x39   : > { %p877_p9 = pneg %p876_p7 }
  0x3b   : > { %p884_p4 = pnand %p883_p1, %p877_p9 }
  0x3d   : > { %887 = shalt.err (!%p884_p4)
}
  0x3e   : > { %s1010_s25 = smov 128   ;;  %s1011_s6 = smov 8  }
  0x3f   : > { %762 = dma.hbm_to_vmem [thread:$0]  (!%p1110_p11), %s1311_s3, 4096, %s1114_s10, [#allocation6], %s1010_s25, %s1010_s25, %s1011_s6  }
  0x40   : > { %s34_s12 = sadd.s32 1, %s1000_s22  ;;  %s41_s13 = sadd.s32 1, %s992_s20 }
  0x41   : > { %p36_p13 = scmp.ge.s32.totalorder %s34_s12, 2  ;;  %p48_p6 = scmp.ne.s32.totalorder %s992_s20, %s988_s19 }
  0x42   : > { %p49_p10 = scmp.eq.s32.totalorder %s1004_s23, 0  ;;  %p773_p3 = scmp.lt.s32.totalorder %s1004_s23, 2 }
  0x43   : > { %s1337_s12 = smov (%p36_p13, %s34_s12), 0  ;;  %p1178_p7 = por %p1083_p2, %p48_p6 }
  0x44   : > { %p50_p5 = por %p49_p10, %p48_p6  ;;  %s38_s8 = ssub.s32 %s1000_s22, %s1337_s12 }
  0x45   : > { %s1324_s14 = scalar_select %p1178_p7, 1, 0 }
  0x46   : > { %s220_s15 = sand.u32 1, %s992_s20   ;;  %p39_p9 = scmp.eq.s32.totalorder %s38_s8, 0 }
  0x47   : > { %s633_s10 = sshll.u32 %s220_s15, 3  ;;  %s634_s16 = sshll.u32 %s1000_s22, 7 }
  0x48   : > { %s1187_s17 = scalar_select %p39_p9, %s992_s20, %s41_s13  }
  0x49   : > { %s1192_s25 = scalar_lea.hbm %s1308_s0, %s634_s16  ;;  %s224_s27 = scalar_lea.vmem [#allocation2], %s633_s10 }
  0x4a   : > { %s231_s6 = sshll.u32 %s224_s27, 4  ;;  %p1196_p2 = pnand %p773_p3, %p50_p5  ;;  %s1200_s6 = int_to_ptr.vmem [resolvable:$true] %s231_s6 }
  0x4b   : > { %s221_s11 = scalar_lea.sflag [#allocation3], %s220_s15  ;;  %s888_s13 = scalar_lea.hbm %s1192_s25, 128 }
  0x4c   : > { %p889_p11 = scmp.ne.s32.totalorder %s1192_s25, %s888_s13  ;;  %p890_p12 = pneg %p1196_p2 }
  0x4d   : > { %s893_s16 = scalar_lea.hbm %s1308_s0, 256  ;;  %p894_p4 = scmp.lt.u32.totalorder %s1192_s25, %s1308_s0 }
  0x4e   : > { %p891_p0 = pnand %p890_p12, %p889_p11  ;;  %p895_p13 = scmp.lt.u32.totalorder %s893_s16, %s888_s13 }
  0x4f   : > { %p897_p10 = scmp.lt.u32.totalorder %s888_s13, %s1192_s25 }
  0x50   : > { %p892_p1 = pneg %p891_p0  ;;  %p896_p6 = por %p895_p13, %p894_p4 }
  0x52   : > { %p898_p3 = por %p897_p10, %p896_p6 }
  0x54   : > { %p899_p5 = pnand %p898_p3, %p892_p1 }
  0x56   : > { %902 = shalt.err (!%p899_p5)
}
  0x57   : > { %s903_s15 = scalar_lea.vmem %s1200_s6, 128  ;;  %s1012_s27 = smov [#allocation2]  }
  0x58   : > { %p904_p9 = scmp.ne.s32.totalorder %s1200_s6, %s903_s15  ;;  %s908_s8 = sshll.u32 %s1012_s27, 4  ;;  %s909_s8 = int_to_ptr.vmem [resolvable:$false] %s908_s8 }
  0x59   : > { %s910_s10 = scalar_lea.vmem %s909_s8, 256  ;;  %p911_p7 = scmp.lt.s32.totalorder %s1200_s6, %s909_s8 }
  0x5a   : > { %p906_p11 = pnand %p904_p9, %p890_p12  ;;  %p912_p4 = scmp.lt.s32.totalorder %s910_s10, %s903_s15 }
  0x5c   : > { %p907_p0 = pneg %p906_p11  ;;  %p913_p13 = por %p912_p4, %p911_p7 }
  0x5e   : > { %p914_p6 = pnand %p913_p13, %p907_p0 }
  0x60   : > { %917 = shalt.err (!%p914_p6)
}
  0x61   : > { %766 = dma.hbm_to_vmem [thread:$0]  (!%p1196_p2), %s1192_s25, 128, %s1200_s6, %s221_s11  }
  0x62   : > { %240 = sbr.rel (%p1099_p8) target bundleno = 593 (0x251), region = 40  ;;  %s1230_s13 = sand.u32 (!%p1099_p8), 1, %s988_s19  }
  0x63   : > { %s636_s16 = sshll.u32 (!%p1099_p8), %s1230_s13, 3  ;;  %s243_s24 = scalar_lea.sflag (!%p1099_p8), [#allocation3], %s1230_s13 }
  0x64   : > { %s1236_s7 = scalar_lea.vmem (!%p1099_p8), [#allocation2], %s636_s16  ;;  %p1326_p7 = scmp.ne.s32.totalorder (!%p1099_p8), %s1320_s28, 0 }
  0x69   : > { %971 = dma.done.wait (%p1326_p7), %s243_s24, 128  }
  0x6a   : > { %973 = vsyncadd (%p1326_p7), %s243_s24, 4294967168  ;;  %p1327_p2 = scmp.ne.s32.totalorder %s1318_s26, 0 }
  0x6c   : > { %975 = dma.done.wait (%p1327_p2), [#allocation6], 8192  }
  0x6d   : > { %977 = vsyncadd (%p1327_p2), [#allocation6], 4294959104  ;;  %v1013_v0 = vmov 0.0   ;;  %v294_v1 = vld [vmem:[#allocation5 + $0x8] sm:$0xff]  ;;  %v296_v2 = vld [vmem:[#allocation5 + $0x18] sm:$0xff]  ;;  %s642_s6 = sshll.u32 %s996_s21, 7 }
  0x6e   : > { %434 = vmatprep.mubr.f32.mxu0 %v1013_v0  ;;  %v293_v3 = vld [vmem:[#allocation5] sm:$0xff]  ;;  %v680_v4 = vpack.c.bf16 %v296_v2, %v294_v1  ;;  %v295_v5 = vld [vmem:[#allocation5 + $0x10] sm:$0xff]  ;;  %v298_v6 = vld [vmem:[#allocation5 + $0x28] sm:$0xff]  ;;  %s280_s9 = scalar_lea.vmem [#allocation8], %s636_s16  ;;  %s1259_s8 = scalar_lea.hbm %s1313_s5, %s642_s6 }
  0x6f   : > { %v300_v7 = vld [vmem:[#allocation5 + $0x38] sm:$0xff]  ;;  %v682_v8 = vpack.c.bf16 %v295_v5, %v293_v3  ;;  %v297_v10 = vld [vmem:[#allocation5 + $0x20] sm:$0xff]  ;;  %v299_v11 = vld [vmem:[#allocation5 + $0x30] sm:$0xff]  ;;  %s530_s11 = sshll.u32 %s280_s9, 4  ;;  %s517_s10 = scalar_lea.sflag [#allocation4], %s1230_s13  ;;  %s1261_s11 = int_to_ptr.vmem [resolvable:$true] %s530_s11 }
  0x70   : > { %v684_v9 = vpack.c.bf16 %v300_v7, %v298_v6  ;;  %v302_v12 = vld [vmem:[#allocation5 + $0x48] sm:$0xff]  ;;  %681 = vmatprep.subr.bf16.mxu0 %v680_v4  ;;  %v304_v13 = vld [vmem:[#allocation5 + $0x58] sm:$0xff]  ;;  %v686_v14 = vpack.c.bf16 %v299_v11, %v297_v10  ;;  %v301_v16 = vld [vmem:[#allocation5 + $0x40] sm:$0xff]  ;;  %s918_s24 = scalar_lea.vmem %s1261_s11, 128  ;;  %p1328_p12 = scmp.ne.s32.totalorder %s1324_s14, 0 }
  0x71   : > { %683 = vmatpush1.bf16.msra.mxu0 %v682_v8  ;;  %v688_v15 = vpack.c.bf16 %v304_v13, %v302_v12  ;;  %v303_v17 = vld [vmem:[#allocation5 + $0x50] sm:$0xff]  ;;  %v306_v18 = vld [vmem:[#allocation5 + $0x68] sm:$0xff]  ;;  %v308_v19 = vld [vmem:[#allocation5 + $0x78] sm:$0xff]  ;;  %p919_p8 = scmp.ne.s32.totalorder %s1261_s11, %s918_s24  ;;  %s1014_s21 = smov [#allocation8]  }
  0x72   : > { %685 = vmatprep.subr.bf16.mxu0 %v684_v9  ;;  %v690_v20 = vpack.c.bf16 %v303_v17, %v301_v16  ;;  %v692_v21 = vpack.c.bf16 %v308_v19, %v306_v18  ;;  %v305_v22 = vld [vmem:[#allocation5 + $0x60] sm:$0xff]  ;;  %v307_v23 = vld [vmem:[#allocation5 + $0x70] sm:$0xff]  ;;  %v310_v24 = vld [vmem:[#allocation5 + $0x88] sm:$0xff]  ;;  %s922_s16 = sshll.u32 %s1014_s21, 4  ;;  %s923_s16 = int_to_ptr.vmem [resolvable:$false] %s922_s16 }
  0x73   : > { %v312_v25 = vld [vmem:[#allocation5 + $0x98] sm:$0xff]  ;;  %v309_v26 = vld [vmem:[#allocation5 + $0x80] sm:$0xff]  ;;  %v311_v27 = vld [vmem:[#allocation5 + $0x90] sm:$0xff]  ;;  %v694_v31 = vpack.c.bf16 %v307_v23, %v305_v22  ;;  %p920_p1 = pnand %p919_p8, %p1328_p12  ;;  %p925_p3 = scmp.lt.s32.totalorder %s1261_s11, %s923_s16 }
  0x74   : > { %v342_v28 = vld [vmem:[#allocation7 + $0x80] sm:$0xff]  ;;  %v343_v29 = vld [vmem:[#allocation7 + $0x88] sm:$0xff]  ;;  %v344_v34 = vld [vmem:[#allocation7 + $0x90] sm:$0xff]  ;;  %v696_v36 = vpack.c.bf16 %v312_v25, %v310_v24  ;;  %v698_v46 = vpack.c.bf16 %v311_v27, %v309_v26 }
  0x75   : > { %687 = vmatpush1.bf16.msra.mxu0 %v686_v14  ;;  %v326_v30 = vld [vmem:[#allocation7] sm:$0xff]  ;;  %v712_v32 = vpack.c.bf16 %v343_v29, %v342_v28  ;;  %v327_v33 = vld [vmem:[#allocation7 + $0x8] sm:$0xff]  ;;  %v345_v35 = vld [vmem:[#allocation7 + $0x98] sm:$0xff]  ;;  %p921_p10 = pneg %p920_p1 }
  0x76   : > { %689 = vmatprep.subr.bf16.mxu0 %v688_v15  ;;  %v714_v37 = vpack.c.bf16 %v327_v33, %v326_v30  ;;  %v716_v38 = vpack.c.bf16 %v345_v35, %v344_v34  ;;  %v328_v39 = vld [vmem:[#allocation7 + $0x10] sm:$0xff]  ;;  %v329_v40 = vld [vmem:[#allocation7 + $0x18] sm:$0xff]  ;;  %v346_v41 = vld [vmem:[#allocation7 + $0xa0] sm:$0xff]  ;;  %v360_v34 = vlaneseq }
  0x77   : > { %v314_v42 = vld [vmem:[#allocation5 + $0xa8] sm:$0xff]  ;;  %v316_v43 = vld [vmem:[#allocation5 + $0xb8] sm:$0xff]  ;;  %713 = vmatprep.subr.bf16.mxu1 %v712_v32  ;;  %v718_v45 = vpack.c.bf16 %v329_v40, %v328_v39  ;;  %v313_v47 = vld [vmem:[#allocation5 + $0xa0] sm:$0xff] }
  0x78   : > { %v347_v44 = vld [vmem:[#allocation7 + $0xa8] sm:$0xff]  ;;  %715 = vmatpush3.bf16.msra.mxu1 %v714_v37  ;;  %v330_v49 = vld [vmem:[#allocation7 + $0x20] sm:$0xff]  ;;  %v700_v51 = vpack.c.bf16 %v316_v43, %v314_v42  ;;  %v315_v52 = vld [vmem:[#allocation5 + $0xb0] sm:$0xff]  ;;  %v361_v35 = vshrl.u32 %v360_v34, 7 }
  0x79   : > { %691 = vmatpush1.bf16.msra.mxu0 %v690_v20  ;;  %717 = vmatprep.subr.bf16.mxu1 %v716_v38  ;;  %v720_v48 = vpack.c.bf16 %v347_v44, %v346_v41  ;;  %v331_v50 = vld [vmem:[#allocation7 + $0x28] sm:$0xff]  ;;  %v348_v53 = vld [vmem:[#allocation7 + $0xb0] sm:$0xff]  ;;  %v349_v54 = vld [vmem:[#allocation7 + $0xb8] sm:$0xff]  ;;  %v702_v58 = vpack.c.bf16 %v315_v52, %v313_v47 }
  0x7a   : > { %693 = vmatprep.subr.bf16.mxu0 %v692_v21  ;;  %v318_v55 = vld [vmem:[#allocation5 + $0xc8] sm:$0xff]  ;;  %v320_v56 = vld [vmem:[#allocation5 + $0xd8] sm:$0xff]  ;;  %v722_v57 = vpack.c.bf16 %v331_v50, %v330_v49  ;;  %v317_v59 = vld [vmem:[#allocation5 + $0xc0] sm:$0xff]  ;;  %v724_v60 = vpack.c.bf16 %v349_v54, %v348_v53  ;;  %v366_v38 = vsub.s32 1, %v361_v35 }
  0x7b   : > { %v332_v61 = vld [vmem:[#allocation7 + $0x30] sm:$0xff]  ;;  %v333_v62 = vld [vmem:[#allocation7 + $0x38] sm:$0xff]  ;;  %v704_v63 = vpack.c.bf16 %v320_v56, %v318_v55  ;;  %v350_v1 = vld [vmem:[#allocation7 + $0xc0] sm:$0xff] }
  0x7c   : > { %719 = vmatpush3.bf16.msra.mxu1 %v718_v45  ;;  %v319_v0 = vld [vmem:[#allocation5 + $0xd0] sm:$0xff]  ;;  %v351_v2 = vld [vmem:[#allocation7 + $0xc8] sm:$0xff]  ;;  %v324_v4 = vld [vmem:[#allocation5 + $0xf8] sm:$0xff]  ;;  %v726_v5 = vpack.c.bf16 %v333_v62, %v332_v61 }
  0x7d   : > { %695 = vmatpush1.bf16.msra.mxu0 %v694_v31  ;;  %721 = vmatprep.subr.bf16.mxu1 %v720_v48  ;;  %v322_v3 = vld [vmem:[#allocation5 + $0xe8] sm:$0xff]  ;;  %v706_v6 = vpack.c.bf16 %v319_v0, %v317_v59  ;;  %v321_v7 = vld [vmem:[#allocation5 + $0xe0] sm:$0xff]  ;;  %v728_v8 = vpack.c.bf16 %v351_v2, %v350_v1  ;;  %v323_v12 = vld [vmem:[#allocation5 + $0xf0] sm:$0xff] }
  0x7e   : > { %697 = vmatprep.subr.bf16.mxu0 %v696_v36  ;;  %v334_v9 = vld [vmem:[#allocation7 + $0x40] sm:$0xff]  ;;  %v335_v10 = vld [vmem:[#allocation7 + $0x48] sm:$0xff]  ;;  %v708_v11 = vpack.c.bf16 %v324_v4, %v322_v3  ;;  %v352_v13 = vld [vmem:[#allocation7 + $0xd0] sm:$0xff]  ;;  %v710_v16 = vpack.c.bf16 %v323_v12, %v321_v7  ;;  %v362_v36 = vsub.s32 0, %v361_v35 }
  0x7f   : > { %v353_v14 = vld [vmem:[#allocation7 + $0xd8] sm:$0xff]  ;;  %v730_v15 = vpack.c.bf16 %v335_v10, %v334_v9  ;;  %v336_v18 = vld [vmem:[#allocation7 + $0x50] sm:$0xff]  ;;  %v354_v20 = vld [vmem:[#allocation7 + $0xe0] sm:$0xff] }
  0x80   : > { %723 = vmatpush3.bf16.msra.mxu1 %v722_v57  ;;  %v732_v17 = vpack.c.bf16 %v353_v14, %v352_v13  ;;  %v337_v19 = vld [vmem:[#allocation7 + $0x58] sm:$0xff]  ;;  %v355_v21 = vld [vmem:[#allocation7 + $0xe8] sm:$0xff]  ;;  %v338_v25 = vld [vmem:[#allocation7 + $0x60] sm:$0xff] }
  0x81   : > { %699 = vmatpush1.bf16.msra.mxu0 %v698_v46  ;;  %725 = vmatprep.subr.bf16.mxu1 %v724_v60  ;;  %v734_v22 = vpack.c.bf16 %v337_v19, %v336_v18  ;;  %v358_v23 = vld [vmem:[%s1236_s7] sm:$0xff]  ;;  %v736_v24 = vpack.c.bf16 %v355_v21, %v354_v20  ;;  %v339_v26 = vld [vmem:[#allocation7 + $0x68] sm:$0xff]  ;;  %s924_s7 = scalar_lea.vmem %s923_s16, 256 }
  0x82   : > { %701 = vmatprep.subr.bf16.mxu0 %v700_v51  ;;  %v738_v27 = vpack.c.bf16 %v339_v26, %v338_v25  ;;  %v356_v28 = vld [vmem:[#allocation7 + $0xf0] sm:$0xff]  ;;  %v357_v29 = vld [vmem:[#allocation7 + $0xf8] sm:$0xff]  ;;  %p926_p5 = scmp.lt.s32.totalorder %s924_s7, %s918_s24 }
  0x83   : > { %v740_v30 = vpack.c.bf16 %v357_v29, %v356_v28  ;;  %v340_v31 = vld [vmem:[#allocation7 + $0x70] sm:$0xff]  ;;  %v341_v32 = vld [vmem:[#allocation7 + $0x78] sm:$0xff] }
  0x84   : > { %727 = vmatpush3.bf16.msra.mxu1 %v726_v5  ;;  %v742_v33 = vpack.c.bf16 %v341_v32, %v340_v31  ;;  %v325_v37 = vld [vmem:[%s1310_s2] sm:$0x3]  ;;  %p927_p9 = por %p926_p5, %p925_p3 }
  0x85   : > { %703 = vmatpush1.bf16.msra.mxu0 %v702_v58  ;;  %729 = vmatprep.subr.bf16.mxu1 %v728_v8  ;;  %v363_v39 = vrot.slane %v325_v37, %v362_v36  ;;  %v367_v40 = vrot.slane %v325_v37, %v366_v38  ;;  %v640_v48 = vld [vmem:[%s1312_s4] ss:$0 sm:$0xff] }
  0x86   : > { %705 = vmatprep.subr.bf16.mxu0 %v704_v63  ;;  %p928_p11 = pnand %p927_p9, %p921_p10 }
  0x88   : > { %731 = vmatpush3.bf16.msra.mxu1 %v730_v15 }
  0x89   : > { %707 = vmatpush1.bf16.msra.mxu0 %v706_v6  ;;  %733 = vmatprep.subr.bf16.mxu1 %v732_v17 }
  0x8a   : > { %709 = vmatprep.subr.bf16.mxu0 %v708_v11 }
  0x8c   : > { %735 = vmatpush3.bf16.msra.mxu1 %v734_v22 }
  0x8d   : > { %711 = vmatpush1.bf16.msra.mxu0 %v710_v16  ;;  %737 = vmatprep.subr.bf16.mxu1 %v736_v24 }
  0x90   : > { %435 = vmatmul.mubr.f32.vlgmr.msra.gmra.mrb[0].mxu0 %v358_v23  ;;  %739 = vmatpush3.bf16.msra.mxu1 %v738_v27 }
  0x91   : > { %741 = vmatprep.subr.bf16.mxu1 %v740_v30 }
  0x94   : > { %743 = vmatpush3.bf16.msra.mxu1 %v742_v33 }
 0x163   : > { %v436_v41 = vpop.f32.mrb[0].mxu0 }
 0x164   : > { %v437_v42 = vadd.f32 %v436_v41, %v363_v39  ;;  %v438_v43 = vpop.f32.mrb[1].mxu0 }
 0x165   : > { %v439_v44 = vadd.f32 %v438_v43, %v367_v40 }
 0x166   : > { %v441_v46 = vmax.f32 %v437_v42, 0.0 }
 0x167   : > { %v442_v45 = vmax.f32 %v439_v44, 0.0 }
 0x169   : > { %508 = vmatprep.mubr.f32.mxu1 %v442_v45 }
 0x16a   : > { %509 = vmatmul.mubr.f32.vlgmr.msra.gmra.mrb[0].mxu1 %v441_v46 }
 0x23d   : > { %v677_v47 = vpop.f32.mrb[0].mxu1 }
 0x23e   : > { %v678_v49 = vpop.f32.mrb[1].mxu1 }
 0x23f   : > { %v679_v50 = vadd.f32 %v678_v49, %v677_v47 }
 0x241   : > { %v514_v51 = vadd.f32 %v679_v50, %v640_v48 }
 0x243   : > { %515 = vst [vmem:[%s280_s9] sm:$0xff] %v514_v51 }
 0x244   : > { %931 = shalt.err (!%p928_p11)
}
 0x245   : > { %s932_s13 = scalar_lea.hbm %s1259_s8, 128  ;;  %s936_s30 = scalar_lea.hbm %s1313_s5, 256 }
 0x246   : > { %p933_p0 = scmp.ne.s32.totalorder %s1259_s8, %s932_s13  ;;  %p937_p6 = scmp.lt.u32.totalorder %s1259_s8, %s1313_s5 }
 0x247   : > { %p938_p7 = scmp.lt.u32.totalorder %s936_s30, %s932_s13  ;;  %p940_p8 = scmp.lt.u32.totalorder %s932_s13, %s1259_s8 }
 0x248   : > { %p934_p4 = pnand %p933_p0, %p1328_p12 }
 0x249   : > { %p939_p2 = por %p938_p7, %p937_p6 }
 0x24a   : > { %p935_p13 = pneg %p934_p4 }
 0x24b   : > { %p941_p1 = por %p940_p8, %p939_p2 }
 0x24d   : > { %p942_p10 = pnand %p941_p1, %p935_p13 }
 0x24f   : > { %945 = shalt.err (!%p942_p10)
}
 0x250   : > { %754 = dma.vmem_to_hbm [thread:$0]  (%p1328_p12), %s1261_s11, 128, %s1259_s8, %s517_s10  }
 0x251 PF: > { %s542_s9 = sand.u32 1, %s984_s18   ;;  %p1329_p3 = scmp.ne.s32.totalorder %s1321_s29, 0 }
 0x252   : > { %p1330_p5 = scmp.ge.s32.totalorder %s1004_s23, 2  ;;  %s543_s15 = scalar_lea.sflag [#allocation4], %s542_s9 }
 0x254   : > { %p768_p9 = pnand %p1330_p5, %p1329_p3 }
 0x256   : > { %979 = dma.done.wait (!%p768_p9), %s543_s15, 128  }
 0x257   : > { %981 = vsyncadd (!%p768_p9), %s543_s15, 4294967168  ;;  %s22_s23 = sadd.s32 1, %s1004_s23   ;;  %s1331_s18 = smov %s988_s19 }
 0x258   : > { %p19_p11 = scmp.ge.s32.totalorder %s22_s23, 4   ;;  %s1332_s19 = smov %s992_s20 }
 0x259   : > { %s1333_s20 = smov %s1187_s17  ;;  %s1334_s21 = smov %s1000_s22 }
 0x25a   : > { %s1335_s22 = smov %s1337_s12  ;;  %21 = sbr.rel (!%p19_p11) target bundleno = 7 (0x7), region = 97 }
 0x261   :  { %548 = vsyncpa [#allocation3], 1 }
 0x262   :  { %550 = vsyncpa [#allocation3 + $0x1], 1 }
 0x263   :  { %551 = vsyncpa [#allocation6], 1 }
 0x264   :  { %552 = vsyncpa [#allocation4], 1 }
 0x265   :  { %554 = vsyncpa [#allocation4 + $0x1], 1 }

</bundles_post_ra>
